<compile_context>
chip_gen: v7x
topology: tpu7x:2x2x1
jax: 0.10.0
libtpu: 0.0.40
codegen_flags: <defaults>
</compile_context>

<pallas_src>
import functools

import jax
import jax.numpy as jnp
from jax.experimental import pallas as pl
from jax.experimental.pallas import tpu as pltpu


MATMUL_INPUT_DTYPE = jnp.bfloat16   # MXU inputs (accumulation stays f32)


def _round_up(x, m):
    return (x + m - 1) // m * m


def _pad2(x, rows, cols):
    r, c = x.shape
    if r == rows and c == cols:
        return x
    return jnp.pad(x, ((0, rows - r), (0, cols - c)))


# ----------------------------------------------------------------------------
# Generic tiled matmul (+bias, optional ReLU): out = act(x @ w + b)
#   grid = (M/tm, N/tn, K/tk), f32 VMEM accumulator, bias/act applied at last K step.
# ----------------------------------------------------------------------------
def _matmul_kernel(x_ref, w_ref, b_ref, o_ref, acc_ref, *, activation):
    @pl.when(pl.program_id(2) == 0)
    def _():
        acc_ref[...] = jnp.zeros_like(acc_ref)

    acc_ref[...] += jnp.dot(x_ref[...], w_ref[...],
                            preferred_element_type=jnp.float32)

    @pl.when(pl.program_id(2) == pl.num_programs(2) - 1)
    def _():
        y = acc_ref[...] + b_ref[...]
        if activation == "relu":
            y = jnp.maximum(y, 0.0)
        o_ref[...] = y


def matmul_bias(x, w, b=None, activation=None, *, tm=128, tn=128, tk=512,
                mxu_dtype=MATMUL_INPUT_DTYPE):
    m_dim, k_dim = x.shape
    k2, n_dim = w.shape
    assert k_dim == k2
    if b is None:
        b = jnp.zeros((1, n_dim), jnp.float32)
    b = b.reshape(1, n_dim).astype(jnp.float32)

    tm = min(tm, _round_up(m_dim, 8))
    tn = min(tn, _round_up(n_dim, 128))
    tk = min(tk, _round_up(k_dim, 128))
    mp, np_, kp = _round_up(m_dim, tm), _round_up(n_dim, tn), _round_up(k_dim, tk)

    xp = _pad2(x, mp, kp).astype(mxu_dtype)
    wp = _pad2(w, kp, np_).astype(mxu_dtype)
    bp = _pad2(b, 1, np_)

    grid = (mp // tm, np_ // tn, kp // tk)
    flops = 2 * mp * np_ * kp
    bytes_accessed = ((mp * kp + kp * np_) * xp.dtype.itemsize
                      + mp * np_ * 4 + np_ * 4)

    out = pl.pallas_call(
        functools.partial(_matmul_kernel, activation=activation),
        out_shape=jax.ShapeDtypeStruct((mp, np_), jnp.float32),
        grid_spec=pltpu.PrefetchScalarGridSpec(
            num_scalar_prefetch=0,
            grid=grid,
            in_specs=[pl.BlockSpec((tm, tk), lambda i, j, k: (i, k)),
                      pl.BlockSpec((tk, tn), lambda i, j, k: (k, j)),
                      pl.BlockSpec((1, tn), lambda i, j, k: (0, j))],
            out_specs=pl.BlockSpec((tm, tn), lambda i, j, k: (i, j)),
            scratch_shapes=[pltpu.VMEM((tm, tn), jnp.float32)]),
        compiler_params=pltpu.CompilerParams(
            dimension_semantics=("parallel", "parallel", "arbitrary")),
        cost_estimate=pl.CostEstimate(flops=flops, transcendentals=0,
                                      bytes_accessed=bytes_accessed),
    )(xp, wp, bp)
    return out[:m_dim, :n_dim]


# ----------------------------------------------------------------------------
# Row-wise log-softmax kernel (used for the hoisted train-mode output projection)
# ----------------------------------------------------------------------------
def _log_softmax_kernel(x_ref, o_ref):
    x = x_ref[...]
    m = jnp.max(x, axis=-1, keepdims=True)
    lse = m + jnp.log(jnp.sum(jnp.exp(x - m), axis=-1, keepdims=True))
    o_ref[...] = x - lse


def log_softmax_rows(x, *, tm=128):
    m_rows, n_cols = x.shape
    tm = min(tm, _round_up(m_rows, 8))
    mp = _round_up(m_rows, tm)
    xp = x if mp == m_rows else jnp.pad(x, ((0, mp - m_rows), (0, 0)))
    out = pl.pallas_call(
        _log_softmax_kernel,
        out_shape=jax.ShapeDtypeStruct((mp, n_cols), jnp.float32),
        grid_spec=pltpu.PrefetchScalarGridSpec(
            num_scalar_prefetch=0,
            grid=(mp // tm,),
            in_specs=[pl.BlockSpec((tm, n_cols), lambda i: (i, 0))],
            out_specs=pl.BlockSpec((tm, n_cols), lambda i: (i, 0))),
        compiler_params=pltpu.CompilerParams(dimension_semantics=("parallel",)),
    )(xp)
    return out[:m_rows]


# ----------------------------------------------------------------------------
# Recurrent LSTM scan kernel (shared by encoder and train-mode decoder).
# The input projection x_t @ W_in + b is precomputed (hoisted); the kernel only
# does gates = xg_t + h @ Whh.  Sequences live as [B, T*feat]; per-step block
# (B, feat) strides along the lane axis -> no wrapper transposes, lane-dense stores.
# ----------------------------------------------------------------------------
def _lstm_scan_kernel(h0_ref, c0_ref, xg_ref, whh_ref,
                      hseq_ref, hN_ref, cN_ref, h_s, c_s):
    t = pl.program_id(0)
    nsteps = pl.num_programs(0)

    @pl.when(t == 0)
    def _():
        h_s[...] = h0_ref[...]
        c_s[...] = c0_ref[...]

    h = h_s[...]
    c = c_s[...]
    gates = xg_ref[...] + jnp.dot(h, whh_ref[...],
                                  preferred_element_type=jnp.float32)
    hh = h.shape[-1]                       # hh is a multiple of 128 -> aligned slices
    i_g = jax.nn.sigmoid(gates[:, 0 * hh:1 * hh])
    f_g = jax.nn.sigmoid(gates[:, 1 * hh:2 * hh])
    g_g = jnp.tanh(gates[:, 2 * hh:3 * hh])
    o_g = jax.nn.sigmoid(gates[:, 3 * hh:4 * hh])
    c_new = f_g * c + i_g * g_g
    h_new = o_g * jnp.tanh(c_new)
    h_s[...] = h_new
    c_s[...] = c_new
    hseq_ref[...] = h_new

    @pl.when(t == nsteps - 1)              # write final state only once
    def _():
        hN_ref[...] = h_new
        cN_ref[...] = c_new


def lstm_scan(xg, h0, c0, whh):
    # xg: [B, T, 4H] precomputed input gates; returns h_seq [B, T, H], h_n, c_n [B, H]
    batch, t_steps, four_h = xg.shape
    hid = four_h // 4
    xg2 = xg.reshape(batch, t_steps * four_h)

    hseq2, h_n, c_n = pl.pallas_call(
        _lstm_scan_kernel,
        out_shape=(jax.ShapeDtypeStruct((batch, t_steps * hid), jnp.float32),
                   jax.ShapeDtypeStruct((batch, hid), jnp.float32),
                   jax.ShapeDtypeStruct((batch, hid), jnp.float32)),
        grid_spec=pltpu.PrefetchScalarGridSpec(
            num_scalar_prefetch=0,
            grid=(t_steps,),
            in_specs=[pl.BlockSpec((batch, hid), lambda t: (0, 0)),      # h0
                      pl.BlockSpec((batch, hid), lambda t: (0, 0)),      # c0
                      pl.BlockSpec((batch, four_h), lambda t: (0, t)),   # xg step t
                      pl.BlockSpec((hid, four_h), lambda t: (0, 0))],    # whh
            out_specs=(pl.BlockSpec((batch, hid), lambda t: (0, t)),     # h_seq step t
                       pl.BlockSpec((batch, hid), lambda t: (0, 0)),     # h_n
                       pl.BlockSpec((batch, hid), lambda t: (0, 0))),    # c_n
            scratch_shapes=[pltpu.VMEM((batch, hid), jnp.float32),
                            pltpu.VMEM((batch, hid), jnp.float32)]),
        compiler_params=pltpu.CompilerParams(dimension_semantics=("arbitrary",)),
    )(h0, c0, xg2, whh)
    return hseq2.reshape(batch, t_steps, hid), h_n, c_n


# ----------------------------------------------------------------------------
# Encoder: hoisted input projection (big matmul) + recurrent scan
# ----------------------------------------------------------------------------
def lstm_encoder(vid_feats, wih, whh, b):
    batch, t_steps, d = vid_feats.shape
    hid = whh.shape[0]
    xg = matmul_bias(vid_feats.reshape(batch * t_steps, d), wih, b)     # [B*T, 4H]
    xg = xg.reshape(batch, t_steps, 4 * hid)
    zeros = jnp.zeros((batch, hid), jnp.float32)
    h_seq, h_n, c_n = lstm_scan(xg, zeros, zeros, whh)
    encoder_outputs = h_seq                                             # [B, T, H]
    encoder_hidden = (h_n[None], c_n[None])                             # ([1,B,H], [1,B,H])
    return encoder_outputs, encoder_hidden


# ----------------------------------------------------------------------------
# Inference decoder kernel (greedy argmax feedback must stay inside the loop).
# Input projections are hoisted: xc = ctx@Wxc + b (constant per step) and
# emb_xe = embed@Wxe (token -> gate-contribution table), so the per-step work is
# one fused token matmul, h@Whh, the output projection and the argmax.
# ----------------------------------------------------------------------------
def _decoder_infer_kernel(h0_ref, c0_ref, xc_ref, embxe_ref, whh_ref, wo_ref, bo_ref,
                          prob_ref, pred_ref,
                          h_s, c_s, prev_s, pred_s, *, sos_id):
    t = pl.program_id(0)
    nsteps = pl.num_programs(0)
    batch, vocab = prev_s.shape
    t_dec = pred_s.shape[1]

    @pl.when(t == 0)
    def _():
        h_s[...] = h0_ref[...]
        c_s[...] = c0_ref[...]
        iota0 = jax.lax.broadcasted_iota(jnp.int32, (batch, vocab), 1)
        prev_s[...] = (iota0 == sos_id).astype(jnp.float32)
        pred_s[...] = jnp.zeros_like(pred_s)

    h = h_s[...]
    c = c_s[...]
    # TODO(synk): the data-dependent token feedback uses a one-hot @ (embed@Wxe) matmul
    # instead of an in-kernel dynamic row gather (no portable Pallas gather for
    # runtime-computed per-row indices); mathematically identical.
    xg = xc_ref[...] + jnp.dot(prev_s[...], embxe_ref[...],
                               preferred_element_type=jnp.float32)
    gates = xg + jnp.dot(h, whh_ref[...], preferred_element_type=jnp.float32)
    hh = h.shape[-1]
    i_g = jax.nn.sigmoid(gates[:, 0 * hh:1 * hh])
    f_g = jax.nn.sigmoid(gates[:, 1 * hh:2 * hh])
    g_g = jnp.tanh(gates[:, 2 * hh:3 * hh])
    o_g = jax.nn.sigmoid(gates[:, 3 * hh:4 * hh])
    c_new = f_g * c + i_g * g_g
    h_new = o_g * jnp.tanh(c_new)
    h_s[...] = h_new
    c_s[...] = c_new

    logits = jnp.dot(h_new, wo_ref[...],
                     preferred_element_type=jnp.float32) + bo_ref[...]   # [B, V]
    m = jnp.max(logits, axis=-1, keepdims=True)
    lse = m + jnp.log(jnp.sum(jnp.exp(logits - m), axis=-1, keepdims=True))
    prob_ref[...] = logits - lse                                         # log-softmax

    # first-occurrence argmax via iota (matches torch.max semantics)
    iota = jax.lax.broadcasted_iota(jnp.int32, (batch, vocab), 1)
    pred = jnp.min(jnp.where(logits == m, iota, vocab), axis=-1, keepdims=True)
    prev_s[...] = (iota == pred).astype(jnp.float32)                     # feedback

    # accumulate predictions in VMEM; single lane-dense store at the last step
    col = jax.lax.broadcasted_iota(jnp.int32, (batch, t_dec), 1)
    pred_s[...] = jnp.where(col == t,
                            jnp.broadcast_to(pred, (batch, t_dec)),
                            pred_s[...])

    @pl.when(t == nsteps - 1)
    def _():
        pred_ref[...] = pred_s[...]


# ----------------------------------------------------------------------------
# Decoder wrapper (train = teacher forcing with fully hoisted projections;
#                  inference = greedy argmax feedback kernel)
# ----------------------------------------------------------------------------
def lstm_decoder(encoder_outputs, encoder_hidden, params,
                 target_variable=None, mode="train", max_len=6, sos_id=1):
    batch, _, hid = encoder_outputs.shape
    vocab = params["dec_embed"].shape[0]
    t_dec = max_len - 1

    h0 = encoder_hidden[0][0]                           # [B, H]
    c0 = encoder_hidden[1][0]                           # [B, H]
    ctx = jnp.mean(encoder_outputs, axis=1)             # [B, H] mean-pooled context

    # hoisted, time-independent projections (Pallas tiled matmuls)
    xc = matmul_bias(ctx, params["dec_w_xc"], params["dec_b"])           # [B, 4H]
    emb_xe = matmul_bias(params["dec_embed"], params["dec_w_xe"])        # [V, 4H]

    if mode == "train":
        # teacher forcing: step 0 input is SOS, step t (>=1) input is target[:, t]
        in_tok = jnp.concatenate(
            [jnp.full((batch, 1), sos_id, jnp.int32),
             target_variable[:, 1:max_len - 1].astype(jnp.int32)], axis=1)  # [B, Tdec]
        xg = jnp.take(emb_xe, in_tok, axis=0) + xc[:, None, :]           # [B, Tdec, 4H]
        h_seq, _, _ = lstm_scan(xg, h0, c0, params["dec_whh"])           # [B, Tdec, H]
        logits = matmul_bias(h_seq.reshape(batch * t_dec, hid),
                             params["dec_wo"], params["dec_bo"])         # [B*Tdec, V]
        seq_prob = log_softmax_rows(logits).reshape(batch, t_dec, vocab)
        return seq_prob, []                                              # reference contract

    # inference: greedy decoding with in-kernel feedback
    prob_flat, preds = pl.pallas_call(
        functools.partial(_decoder_infer_kernel, sos_id=sos_id),
        out_shape=(jax.ShapeDtypeStruct((batch, t_dec * vocab), jnp.float32),
                   jax.ShapeDtypeStruct((batch, t_dec), jnp.int32)),
        grid_spec=pltpu.PrefetchScalarGridSpec(
            num_scalar_prefetch=0,
            grid=(t_dec,),
            in_specs=[pl.BlockSpec((batch, hid), lambda t: (0, 0)),          # h0
                      pl.BlockSpec((batch, hid), lambda t: (0, 0)),          # c0
                      pl.BlockSpec((batch, 4 * hid), lambda t: (0, 0)),      # xc
                      pl.BlockSpec((vocab, 4 * hid), lambda t: (0, 0)),      # emb@Wxe
                      pl.BlockSpec((hid, 4 * hid), lambda t: (0, 0)),        # whh
                      pl.BlockSpec((hid, vocab), lambda t: (0, 0)),          # wo
                      pl.BlockSpec((1, vocab), lambda t: (0, 0))],           # bo
            out_specs=(pl.BlockSpec((batch, vocab), lambda t: (0, t)),       # log-probs
                       pl.BlockSpec((batch, t_dec), lambda t: (0, 0))),      # preds
            scratch_shapes=[pltpu.VMEM((batch, hid), jnp.float32),
                            pltpu.VMEM((batch, hid), jnp.float32),
                            pltpu.VMEM((batch, vocab), jnp.float32),
                            pltpu.VMEM((batch, t_dec), jnp.int32)]),
        compiler_params=pltpu.CompilerParams(dimension_semantics=("arbitrary",)),
    )(h0, c0, xc, emb_xe, params["dec_whh"], params["dec_wo"], params["dec_bo"])

    seq_prob = prob_flat.reshape(batch, t_dec, vocab)
    return seq_prob, preds                                               # preds: [B, Tdec]


# ----------------------------------------------------------------------------
# Full model forward (== EventsCaptionModel0.forward)
# ----------------------------------------------------------------------------
def events_caption_model_forward(params, event_tensor, target_variable=None,
                                 mode="train", max_len=6):
    b, t_steps, num_bins, h_img, w_img = event_tensor.shape
    dim_vid = params["cnn_w"].shape[1]

    # per-frame CNN (full-extent Conv2d + ReLU) as one tiled Pallas matmul over all frames
    frames_flat = event_tensor.reshape(b * t_steps, num_bins * h_img * w_img)
    vid_feats = matmul_bias(frames_flat, params["cnn_w"], params["cnn_b"],
                            activation="relu").reshape(b, t_steps, dim_vid)

    encoder_outputs, encoder_hidden = lstm_encoder(
        vid_feats, params["enc_wih"], params["enc_whh"], params["enc_b"])

    seq_prob, seq_preds = lstm_decoder(
        encoder_outputs, encoder_hidden, params,
        target_variable=target_variable, mode=mode, max_len=max_len)
    return seq_prob, seq_preds


# ----------------------------------------------------------------------------
# Deterministic parameter init + example run
# ----------------------------------------------------------------------------
def init_params(key, *, num_bins, h_img, w_img, dim_vid, hid, emb_dim, vocab):
    ks = jax.random.split(key, 12)
    s = 0.1
    return {
        "cnn_w":  s * jax.random.normal(ks[0], (num_bins * h_img * w_img, dim_vid), jnp.float32),
        "cnn_b":  s * jax.random.normal(ks[1], (1, dim_vid), jnp.float32),
        "enc_wih": s * jax.random.normal(ks[2], (dim_vid, 4 * hid), jnp.float32),
        "enc_whh": s * jax.random.normal(ks[3], (hid, 4 * hid), jnp.float32),
        "enc_b":   s * jax.random.normal(ks[4], (1, 4 * hid), jnp.float32),
        "dec_embed": s * jax.random.normal(ks[5], (vocab, emb_dim), jnp.float32),
        "dec_w_xe":  s * jax.random.normal(ks[6], (emb_dim, 4 * hid), jnp.float32),
        "dec_w_xc":  s * jax.random.normal(ks[7], (hid, 4 * hid), jnp.float32),
        "dec_whh":   s * jax.random.normal(ks[8], (hid, 4 * hid), jnp.float32),
        "dec_b":     s * jax.random.normal(ks[9], (1, 4 * hid), jnp.float32),
        "dec_wo":    s * jax.random.normal(ks[10], (hid, vocab), jnp.float32),
        "dec_bo":    s * jax.random.normal(ks[11], (1, vocab), jnp.float32),
    }


if __name__ == "__main__":
    # small, TPU-friendly shapes: B multiple of 8 (sublanes), feature dims multiples of 128
    B, T, NUM_BINS, H_IMG, W_IMG = 8, 8, 4, 16, 16
    DIM_VID, HID, EMB, VOCAB, MAX_LEN = 128, 128, 128, 128, 6

    key = jax.random.PRNGKey(0)
    k_par, k_evt, k_tgt = jax.random.split(key, 3)

    params = init_params(k_par, num_bins=NUM_BINS, h_img=H_IMG, w_img=W_IMG,
                         dim_vid=DIM_VID, hid=HID, emb_dim=EMB, vocab=VOCAB)

    event_tensor = jax.random.normal(k_evt, (B, T, NUM_BINS, H_IMG, W_IMG), jnp.float32)
    target_variable = jax.random.randint(k_tgt, (B, MAX_LEN), 0, VOCAB, dtype=jnp.int32)

    # inference (greedy decoding) -> seq_prob [B, MAX_LEN-1, VOCAB], seq_preds [B, MAX_LEN-1]
    seq_prob, seq_preds = events_caption_model_forward(
        params, event_tensor, mode="inference", max_len=MAX_LEN)
    jax.block_until_ready(seq_prob)
    jax.block_until_ready(seq_preds)

    # train (teacher forcing) -> seq_prob [B, MAX_LEN-1, VOCAB], seq_preds == []
    seq_prob_tr, seq_preds_tr = events_caption_model_forward(
        params, event_tensor, target_variable=target_variable,
        mode="train", max_len=MAX_LEN)
    jax.block_until_ready(seq_prob_tr)

    assert seq_prob.shape == (B, MAX_LEN - 1, VOCAB)
    assert seq_preds.shape == (B, MAX_LEN - 1)
    assert seq_prob_tr.shape == (B, MAX_LEN - 1, VOCAB)
    assert seq_preds_tr == []

    # TODO(synk): the reference delegates to opaque injected cnn/encoder/decoder modules;
    # concrete synthetic instantiations (full-kernel conv CNN, 1-layer LSTM encoder,
    # mean-context LSTM decoder) are used here, so numerics match those definitions.
    print("KERNEL_OK")
</pallas_src>

<mosaic_0001>
module attributes {stable_mosaic.version = 11 : i64} {
  func.func @_matmul_kernel(%arg0: i32, %arg1: i32, %arg2: i32, %arg3: memref<64x512xbf16, #tpu.memory_space<vmem>>, %arg4: memref<512x128xbf16, #tpu.memory_space<vmem>>, %arg5: memref<1x128xf32, #tpu.memory_space<vmem>>, %arg6: memref<64x128xf32, #tpu.memory_space<vmem>>, %arg7: memref<64x128xf32, #tpu.memory_space<vmem>>) attributes {dimension_semantics = [#tpu.dimension_semantics<parallel>, #tpu.dimension_semantics<parallel>, #tpu.dimension_semantics<arbitrary>], iteration_bounds = array<i64: 1, 1, 2>, scalar_prefetch = 0 : i64, scratch_operands = 1 : i64, tpu.core_type = #tpu.core_type<tc>, window_params = [{transform_indices = @transform_0, window_bounds = array<i64: 64, 512>}, {transform_indices = @transform_1, window_bounds = array<i64: 512, 128>}, {transform_indices = @transform_2, window_bounds = array<i64: 1, 128>}, {transform_indices = @transform_3, window_bounds = array<i64: 64, 128>}]} {
    %c0_i32 = arith.constant 0 : i32
    %0 = arith.cmpi eq, %arg2, %c0_i32 : i32
    %1 = arith.extui %0 : i1 to i32
    %c0_i32_0 = arith.constant 0 : i32
    %2 = arith.cmpi ne, %1, %c0_i32_0 : i32
    scf.if %2 {
      %cst_9 = arith.constant 0.000000e+00 : f32
      %12 = vector.broadcast %cst_9 : f32 to vector<64x128xf32>
      %c0_10 = arith.constant 0 : index
      %c0_11 = arith.constant 0 : index
      %13 = vector.load %arg7[%c0_10, %c0_11] : memref<64x128xf32, #tpu.memory_space<vmem>>, vector<64x128xf32>
      tpu.vector_store %arg7[%c0_10, %c0_11], %12 {strides = array<i32>} : memref<64x128xf32, #tpu.memory_space<vmem>>, vector<64x128xf32>,
    } else {
    }
    %c0 = arith.constant 0 : index
    %c0_1 = arith.constant 0 : index
    %3 = vector.load %arg7[%c0, %c0_1] : memref<64x128xf32, #tpu.memory_space<vmem>>, vector<64x128xf32>
    %c0_2 = arith.constant 0 : index
    %c0_3 = arith.constant 0 : index
    %4 = vector.load %arg3[%c0_2, %c0_3] : memref<64x512xbf16, #tpu.memory_space<vmem>>, vector<64x512xbf16>
    %c0_4 = arith.constant 0 : index
    %c0_5 = arith.constant 0 : index
    %5 = vector.load %arg4[%c0_4, %c0_5] : memref<512x128xbf16, #tpu.memory_space<vmem>>, vector<512x128xbf16>
    %cst = arith.constant dense<0.000000e+00> : vector<64x128xf32>
    %6 = tpu.matmul %4, %5, %cst {dimension_numbers = #tpu.dot_dimension_numbers<[1], [0], [0], [1], [0, 0, 1, 1], [], []>} : vector<64x512xbf16>, vector<512x128xbf16>, vector<64x128xf32> -> vector<64x128xf32>
    %7 = arith.addf %3, %6 : vector<64x128xf32>
    %c0_6 = arith.constant 0 : index
    %c0_7 = arith.constant 0 : index
    %8 = vector.load %arg7[%c0_6, %c0_7] : memref<64x128xf32, #tpu.memory_space<vmem>>, vector<64x128xf32>
    tpu.vector_store %arg7[%c0_6, %c0_7], %7 {strides = array<i32>} : memref<64x128xf32, #tpu.memory_space<vmem>>, vector<64x128xf32>,
    %c1_i32 = arith.constant 1 : i32
    %9 = arith.cmpi eq, %arg2, %c1_i32 : i32
    %10 = arith.extui %9 : i1 to i32
    %c0_i32_8 = arith.constant 0 : i32
    %11 = arith.cmpi ne, %10, %c0_i32_8 : i32
    scf.if %11 {
      %c0_9 = arith.constant 0 : index
      %c0_10 = arith.constant 0 : index
      %12 = vector.load %arg7[%c0_9, %c0_10] : memref<64x128xf32, #tpu.memory_space<vmem>>, vector<64x128xf32>
      %c0_11 = arith.constant 0 : index
      %c0_12 = arith.constant 0 : index
      %13 = vector.load %arg5[%c0_11, %c0_12] : memref<1x128xf32, #tpu.memory_space<vmem>>, vector<1x128xf32>
      %14 = vector.broadcast %13 : vector<1x128xf32> to vector<64x128xf32>
      %15 = arith.addf %12, %14 : vector<64x128xf32>
      %cst_13 = arith.constant 0.000000e+00 : f32
      %16 = vector.broadcast %cst_13 : f32 to vector<64x128xf32>
      %17 = arith.maximumf %15, %16 : vector<64x128xf32>
      %c0_14 = arith.constant 0 : index
      %c0_15 = arith.constant 0 : index
      %18 = vector.load %arg6[%c0_14, %c0_15] : memref<64x128xf32, #tpu.memory_space<vmem>>, vector<64x128xf32>
      tpu.vector_store %arg6[%c0_14, %c0_15], %17 {strides = array<i32>} : memref<64x128xf32, #tpu.memory_space<vmem>>, vector<64x128xf32>,
    } else {
    }
    return
  }
  func.func @transform_0(%arg0: i32, %arg1: i32, %arg2: i32) -> (i32, i32) {
    %c0_i32 = arith.constant 0 : i32
    return %arg0, %arg2 : i32, i32
  }
  func.func @transform_1(%arg0: i32, %arg1: i32, %arg2: i32) -> (i32, i32) {
    %c0_i32 = arith.constant 0 : i32
    return %arg2, %arg1 : i32, i32
  }
  func.func @transform_2(%arg0: i32, %arg1: i32, %arg2: i32) -> (i32, i32) {
    %c0_i32 = arith.constant 0 : i32
    %c0_i32_0 = arith.constant 0 : i32
    return %c0_i32, %arg1 : i32, i32
  }
  func.func @transform_3(%arg0: i32, %arg1: i32, %arg2: i32) -> (i32, i32) {
    %c0_i32 = arith.constant 0 : i32
    return %arg0, %arg1 : i32, i32
  }
}

</mosaic_0001>

<bundles_post_ra>
// kernel: tpu_custom_call.1
= control target key start
LH: loop header
LB: loop body
LE: loop exit
PB: predicated region body
PF: predicated region fallthrough
CT: control target
= control target key end

     0   :  { %8 = vsyncpa [#allocation4], 0  ;;  %s1664_s0 = inlined_call_operand.hbm [shape: bf16[64,1024], index: 0, kind: input, shape index: {}]   ;;  %s1665_s1 = inlined_call_operand.hbm [shape: bf16[1024,128], index: 1, kind: input, shape index: {}]   ;;  %s1666_s2 = inlined_call_operand.vmem [shape: f32[1,128], index: 2, kind: input, shape index: {}]   ;;  %s1667_s3 = inlined_call_operand.hbm [shape: f32[64,128], index: 3, kind: output, shape index: {}]  }
   0x1   :  { %10 = vsyncpa [#allocation4 + $0x1], 0 }
   0x2   :  { %11 = vsyncpa [#allocation7], 0 }
   0x3   :  { %13 = vsyncpa [#allocation7 + $0x1], 0 }
   0x4   :  { %14 = vsyncpa [#allocation5], 0  ;;  %s1408_s12 = smov 0   ;;  %s1410_s13 = smov 0  }
   0x5   :  { %s1412_s14 = smov 0   ;;  %s1414_s15 = smov 0  }
   0x6   :  { %s1416_s16 = smov 0   ;;  %s1418_s17 = smov 0  }
   0x7 LB: > { %s950_s18 = sadd.s32 4294967295, %s1375_s17   ;;  %s32_s19 = sadd.s32 1, %s1371_s16  ;;  %s1375_s17 = sphi %s1418_s17, %s20_s17   ;;  %s1371_s16 = sphi %s1416_s16, %s1680_s16   ;;  %s1367_s15 = sphi %s1414_s15, %s1679_s15   ;;  %s1363_s14 = sphi %s1412_s14, %s1678_s14   ;;  %s1359_s13 = sphi %s1410_s13, %s1677_s13   ;;  %s1355_s12 = sphi %s1408_s12, %s1676_s12  }
   0x8   : > { %p33_p0 = scmp.ge.s32.totalorder %s32_s19, 2  ;;  %s48_s20 = sadd.s32 1, %s1363_s14 }
   0x9   : > { %p55_p1 = scmp.ne.s32.totalorder %s1363_s14, %s1359_s13  ;;  %p56_p2 = scmp.eq.s32.totalorder %s1375_s17, 0 }
   0xa   : > { %s1682_s19 = smov (%p33_p0, %s32_s19), 0  ;;  %p61_p4 = scmp.ne.s32.totalorder %s1359_s13, %s1355_s12 }
   0xb   : > { %p1444_p3 = por %p56_p2, %p55_p1  ;;  %s44_s22 = ssub.s32 %s1371_s16, %s1682_s19 }
   0xc   : > { %p62_p5 = scmp.eq.s32.totalorder %s950_s18, 0  ;;  %p46_p6 = scmp.eq.s32.totalorder %s44_s22, 0 }
   0xd   : > { %p1115_p8 = scmp.lt.s32.totalorder %s1375_s17, 2  ;;  %s1462_s25 = sand.u32 1, %s1363_s14  }
   0xe   : > { %p1453_p7 = por %p62_p5, %p61_p4  ;;  %s1018_s26 = sshll.u32 %s1371_s16, 8 }
   0xf   : > { %s1459_s24 = scalar_select %p46_p6, %s1363_s14, %s48_s20  }
  0x10   : > { %s1670_s23 = scalar_select %p1453_p7, 1, 0 }
  0x11   : > { %s954_s27 = sshll.u32 %s1462_s25, 7  ;;  %s1469_s30 = scalar_lea.hbm %s1664_s0, %s1018_s26 }
  0x12   : > { %s177_s4 = scalar_lea.vmem [#allocation3], %s954_s27  ;;  %p1473_p9 = pnand %p1115_p8, %p1444_p3 }
  0x13   : > { %s187_s5 = sshll.u32 %s177_s4, 4  ;;  %s174_s7 = scalar_lea.sflag [#allocation4], %s1462_s25  ;;  %s1477_s5 = int_to_ptr.vmem [resolvable:$true] %s187_s5 }
  0x14   : > { %s1231_s8 = scalar_lea.hbm %s1469_s30, 2048  ;;  %p1233_p12 = pneg %p1473_p9 }
  0x15   : > { %p1232_p11 = scmp.ne.s32.totalorder %s1469_s30, %s1231_s8  ;;  %s1236_s11 = scalar_lea.hbm %s1664_s0, 4096 }
  0x16   : > { %p1237_p1 = scmp.lt.u32.totalorder %s1469_s30, %s1664_s0  ;;  %p1238_p2 = scmp.lt.u32.totalorder %s1236_s11, %s1231_s8 }
  0x17   : > { %p1234_p13 = pnand %p1233_p12, %p1232_p11  ;;  %p1240_p4 = scmp.lt.u32.totalorder %s1231_s8, %s1469_s30 }
  0x18   : > { %p1239_p3 = por %p1238_p2, %p1237_p1 }
  0x19   : > { %p1235_p0 = pneg %p1234_p13 }
  0x1a   : > { %p1241_p5 = por %p1240_p4, %p1239_p3 }
  0x1c   : > { %p1242_p6 = pnand %p1241_p5, %p1235_p0 }
  0x1e   : > { %1245 = shalt.err (!%p1242_p6)
}
  0x1f   : > { %s1246_s21 = scalar_lea.vmem %s1477_s5, 2048  ;;  %s1377_s22 = smov [#allocation3]  }
  0x20   : > { %p1247_p8 = scmp.ne.s32.totalorder %s1477_s5, %s1246_s21  ;;  %s1251_s26 = sshll.u32 %s1377_s22, 4  ;;  %s1252_s26 = int_to_ptr.vmem [resolvable:$false] %s1251_s26 }
  0x21   : > { %s1253_s27 = scalar_lea.vmem %s1252_s26, 4096  ;;  %p1254_p10 = scmp.lt.s32.totalorder %s1477_s5, %s1252_s26 }
  0x22   : > { %p1249_p11 = pnand %p1247_p8, %p1233_p12  ;;  %p1255_p1 = scmp.lt.s32.totalorder %s1253_s27, %s1246_s21 }
  0x24   : > { %p1250_p13 = pneg %p1249_p11  ;;  %p1256_p2 = por %p1255_p1, %p1254_p10 }
  0x26   : > { %p1257_p3 = pnand %p1256_p2, %p1250_p13 }
  0x28   : > { %1260 = shalt.err (!%p1257_p3)
}
  0x29   : > { %s1378_s28 = smov 512   ;;  %s1379_s29 = smov 256  }
  0x2a   : > { %s1380_s4 = smov 16   ;;  %p217_p0 = scmp.lt.s32.totalorder %s1375_s17, 3 }
  0x2b   : > { %1111 = dma.hbm_to_vmem [thread:$0]  (!%p1473_p9), %s1469_s30, 2048, %s1477_s5, %s174_s7, %s1378_s28, %s1379_s29, %s1380_s4  }
  0x2c   : > { %s957_s8 = sshll.u32 %s1462_s25, 8  ;;  %s1019_s9 = sshll.u32 %s1371_s16, 12 }
  0x2d   : > { %p1672_p10 = scmp.ge.s32.totalorder %s1375_s17, 1  ;;  %s1520_s20 = scalar_lea.hbm %s1665_s1, %s1019_s9 }
  0x2e   : > { %s201_s21 = scalar_lea.vmem [#allocation6], %s957_s8  ;;  %s198_s30 = scalar_lea.sflag [#allocation7], %s1462_s25 }
  0x2f   : > { %p1513_p4 = pnand %p1672_p10, %p217_p0  ;;  %s209_s22 = sshll.u32 %s201_s21, 4  ;;  %s1522_s22 = int_to_ptr.vmem [resolvable:$true] %s209_s22 }
  0x30   : > { %s1261_s5 = scalar_lea.hbm %s1520_s20, 4096  ;;  %s1266_s27 = scalar_lea.hbm %s1665_s1, 8192 }
  0x31   : > { %p1262_p5 = scmp.ne.s32.totalorder %s1520_s20, %s1261_s5  ;;  %p1267_p11 = scmp.lt.u32.totalorder %s1520_s20, %s1665_s1 }
  0x32   : > { %p1268_p13 = scmp.lt.u32.totalorder %s1266_s27, %s1261_s5  ;;  %p1270_p2 = scmp.lt.u32.totalorder %s1261_s5, %s1520_s20 }
  0x33   : > { %p1264_p6 = pnand %p1262_p5, %p1233_p12 }
  0x34   : > { %p1269_p1 = por %p1268_p13, %p1267_p11 }
  0x35   : > { %p1265_p8 = pneg %p1264_p6 }
  0x36   : > { %p1271_p3 = por %p1270_p2, %p1269_p1 }
  0x38   : > { %p1272_p0 = pnand %p1271_p3, %p1265_p8 }
  0x3a   : > { %1275 = shalt.err (!%p1272_p0)
}
  0x3b   : > { %s1276_s4 = scalar_lea.vmem %s1522_s22, 4096  ;;  %s1381_s8 = smov [#allocation6]  }
  0x3c   : > { %p1277_p10 = scmp.ne.s32.totalorder %s1522_s22, %s1276_s4  ;;  %s1281_s9 = sshll.u32 %s1381_s8, 4  ;;  %s1282_s9 = int_to_ptr.vmem [resolvable:$false] %s1281_s9 }
  0x3d   : > { %s1283_s11 = scalar_lea.vmem %s1282_s9, 8192  ;;  %p1284_p7 = scmp.lt.s32.totalorder %s1522_s22, %s1282_s9 }
  0x3e   : > { %p1279_p5 = pnand %p1277_p10, %p1233_p12  ;;  %p1285_p11 = scmp.lt.s32.totalorder %s1283_s11, %s1276_s4 }
  0x40   : > { %p1280_p6 = pneg %p1279_p5  ;;  %p1286_p13 = por %p1285_p11, %p1284_p7 }
  0x42   : > { %p1287_p1 = pnand %p1286_p13, %p1280_p6 }
  0x44   : > { %1290 = shalt.err (!%p1287_p1)
}
  0x45   : > { %s1382_s12 = smov 64   ;;  %s1383_s21 = smov 4  }
  0x46   : > { %1114 = dma.hbm_to_vmem [thread:$0]  (!%p1473_p9), %s1520_s20, 4096, %s1522_s22, %s198_s30, %s1382_s12, %s1382_s12, %s1383_s21  }
  0x47   : > { %221 = sbr.rel (%p1513_p4) target bundleno = 410 (0x19a), region = 32  ;;  %s223_s5 = sand.u32 (!%p1513_p4), 1, %s1359_s13  }
  0x48   : > { %s961_s7 = sshll.u32 (!%p1513_p4), %s223_s5, 7  ;;  %s224_s26 = scalar_lea.sflag (!%p1513_p4), [#allocation4], %s223_s5 }
  0x49   : > { %s1553_s27 = scalar_lea.vmem (!%p1513_p4), [#allocation3], %s961_s7  ;;  %p1674_p7 = scmp.ne.s32.totalorder (!%p1513_p4), %s1670_s23, 0 }
  0x4e   : > { %1342 = dma.done.wait (%p1674_p7), %s224_s26, 2048  }
  0x4f   : > { %1344 = vsyncadd (%p1674_p7), %s224_s26, 4294965248  ;;  %s962_s28 = sshll.u32 %s223_s5, 8  ;;  %s233_s6 = scalar_lea.sflag [#allocation7], %s223_s5 }
  0x50   : > { %s1559_s25 = scalar_lea.vmem [#allocation6], %s962_s28 }
  0x51   : > { %1346 = dma.done.wait (%p1674_p7), %s233_s6, 4096  }
  0x52   : > { %1348 = vsyncadd (%p1674_p7), %s233_s6, 4294963200  ;;  %p963_p9 = scmp.ne.s32.totalorder %s1367_s15, 0 }
  0x53   : > { %v1384_v0 = vmov (!%p963_p9), 0.0  }
  0x54   : > { %273 = sbr.rel (%p963_p9) target bundleno = 91 (0x5b), region = 44  ;;  %274 = vst [vmem:[#allocation2] sm:$0xff] (!%p963_p9), %v1384_v0  ;;  %275 = vst [vmem:[#allocation2 + $0x8] sm:$0xff] (!%p963_p9), %v1384_v0 }
  0x55   : > { %276 = vst [vmem:[#allocation2 + $0x10] sm:$0xff] (!%p963_p9), %v1384_v0  ;;  %277 = vst [vmem:[#allocation2 + $0x18] sm:$0xff] (!%p963_p9), %v1384_v0 }
  0x56   : > { %278 = vst [vmem:[#allocation2 + $0x20] sm:$0xff] (!%p963_p9), %v1384_v0  ;;  %279 = vst [vmem:[#allocation2 + $0x28] sm:$0xff] (!%p963_p9), %v1384_v0 }
  0x57   : > { %280 = vst [vmem:[#allocation2 + $0x30] sm:$0xff] (!%p963_p9), %v1384_v0  ;;  %281 = vst [vmem:[#allocation2 + $0x38] sm:$0xff] (!%p963_p9), %v1384_v0 }
  0x5b PF: > { %v1175_v1 = vld [vmem:[%s1559_s25 + $0x40] sm:$0xff]   ;;  %v1179_v5 = vld [vmem:[%s1559_s25 + $0x48] sm:$0xff]   ;;  %v1183_v9 = vld [vmem:[%s1559_s25 + $0x50] sm:$0xff]   ;;  %p1012_p12 = scmp.ne.s32.totalorder %s1367_s15, 1 }
  0x5c   : > { %v1176_v2 = vld [vmem:[%s1559_s25 + $0xc0] sm:$0xff]   ;;  %1020 = vmatprep.subr.bf16.mxu0 %v1175_v1  ;;  %v1180_v6 = vld [vmem:[%s1559_s25 + $0xc8] sm:$0xff]   ;;  %v1184_v10 = vld [vmem:[%s1559_s25 + $0xd0] sm:$0xff]  }
  0x5d   : > { %v1177_v3 = vld [vmem:[%s1559_s25] sm:$0xff]   ;;  %1060 = vmatprep.subr.bf16.mxu1 %v1176_v2  ;;  %v1181_v7 = vld [vmem:[%s1559_s25 + $0x8] sm:$0xff]   ;;  %v1185_v11 = vld [vmem:[%s1559_s25 + $0x10] sm:$0xff]  }
  0x5e   : > { %v1178_v4 = vld [vmem:[%s1559_s25 + $0x80] sm:$0xff]   ;;  %1021 = vmatpush3.bf16.msra.mxu0 %v1177_v3  ;;  %v1182_v8 = vld [vmem:[%s1559_s25 + $0x88] sm:$0xff]   ;;  %v1186_v12 = vld [vmem:[%s1559_s25 + $0x90] sm:$0xff]  }
  0x5f   : > { %1061 = vmatpush3.bf16.msra.mxu1 %v1178_v4  ;;  %1022 = vmatprep.subr.bf16.mxu0 %v1179_v5  ;;  %v1187_v13 = vld [vmem:[%s1559_s25 + $0x58] sm:$0xff]   ;;  %v1191_v17 = vld [vmem:[%s1559_s25 + $0x60] sm:$0xff]   ;;  %v1195_v21 = vld [vmem:[%s1559_s25 + $0x68] sm:$0xff]  }
  0x60   : > { %1062 = vmatprep.subr.bf16.mxu1 %v1180_v6  ;;  %v1188_v14 = vld [vmem:[%s1559_s25 + $0xd8] sm:$0xff]   ;;  %v1192_v18 = vld [vmem:[%s1559_s25 + $0xe0] sm:$0xff]   ;;  %v1196_v22 = vld [vmem:[%s1559_s25 + $0xe8] sm:$0xff]  }
  0x61   : > { %v1189_v15 = vld [vmem:[%s1559_s25 + $0x18] sm:$0xff]   ;;  %v1193_v19 = vld [vmem:[%s1559_s25 + $0x20] sm:$0xff]   ;;  %v1197_v23 = vld [vmem:[%s1559_s25 + $0x28] sm:$0xff]  }
  0x62   : > { %1023 = vmatpush3.bf16.msra.mxu0 %v1181_v7  ;;  %v1190_v16 = vld [vmem:[%s1559_s25 + $0x98] sm:$0xff]   ;;  %v1194_v20 = vld [vmem:[%s1559_s25 + $0xa0] sm:$0xff]   ;;  %v1198_v24 = vld [vmem:[%s1559_s25 + $0xa8] sm:$0xff]  }
  0x63   : > { %1063 = vmatpush3.bf16.msra.mxu1 %v1182_v8  ;;  %1024 = vmatprep.subr.bf16.mxu0 %v1183_v9  ;;  %v1199_v25 = vld [vmem:[%s1559_s25 + $0x70] sm:$0xff]   ;;  %v1203_v29 = vld [vmem:[%s1559_s25 + $0x78] sm:$0xff]   ;;  %v282_v58 = vld [vmem:[#allocation2] sm:$0xff] }
  0x64   : > { %1064 = vmatprep.subr.bf16.mxu1 %v1184_v10  ;;  %v1200_v26 = vld [vmem:[%s1559_s25 + $0xf0] sm:$0xff]   ;;  %v1204_v30 = vld [vmem:[%s1559_s25 + $0xf8] sm:$0xff]   ;;  %v283_v63 = vld [vmem:[#allocation2 + $0x8] sm:$0xff] }
  0x65   : > { %v1201_v27 = vld [vmem:[%s1559_s25 + $0x30] sm:$0xff]   ;;  %v1205_v31 = vld [vmem:[%s1559_s25 + $0x38] sm:$0xff]  }
  0x66   : > { %1025 = vmatpush3.bf16.msra.mxu0 %v1185_v11  ;;  %v1202_v28 = vld [vmem:[%s1559_s25 + $0xb0] sm:$0xff]   ;;  %v1206_v32 = vld [vmem:[%s1559_s25 + $0xb8] sm:$0xff]  }
  0x67   : > { %1065 = vmatpush3.bf16.msra.mxu1 %v1186_v12  ;;  %1026 = vmatprep.subr.bf16.mxu0 %v1187_v13  ;;  %v1207_v33 = vld [vmem:[%s1553_s27] ss:$16 sps:$4 sm:$0xff]   ;;  %v1209_v34 = vld [vmem:[%s1553_s27 + $0x4] ss:$16 sps:$4 sm:$0xff]   ;;  %v1210_v35 = vld [vmem:[%s1553_s27 + $0x8] ss:$16 sps:$4 sm:$0xff]  }
  0x68   : > { %1066 = vmatprep.subr.bf16.mxu1 %v1188_v14  ;;  %v1212_v36 = vld [vmem:[%s1553_s27 + $0xc] ss:$16 sps:$4 sm:$0xff]   ;;  %674 = vmatprep.mubr.bf16.mxu0 %v1209_v34  ;;  %v1213_v37 = vld [vmem:[%s1553_s27 + $0x24] ss:$16 sps:$4 sm:$0xff]   ;;  %v1217_v39 = vld [vmem:[%s1553_s27 + $0x20] ss:$16 sps:$4 sm:$0xff]  }
  0x69   : > { %739 = vmatprep.mubr.bf16.mxu1 %v1212_v36  ;;  %v1215_v38 = vld [vmem:[%s1553_s27 + $0x2c] ss:$16 sps:$4 sm:$0xff]   ;;  %v1218_v40 = vld [vmem:[%s1553_s27 + $0x28] ss:$16 sps:$4 sm:$0xff]   ;;  %v1219_v41 = vld [vmem:[%s1553_s27 + $0x44] ss:$16 sps:$4 sm:$0xff]  }
  0x6a   : > { %1027 = vmatpush3.bf16.msra.mxu0 %v1189_v15  ;;  %v1221_v42 = vld [vmem:[%s1553_s27 + $0x4c] ss:$16 sps:$4 sm:$0xff]   ;;  %v1223_v43 = vld [vmem:[%s1553_s27 + $0x40] ss:$16 sps:$4 sm:$0xff]   ;;  %v1224_v44 = vld [vmem:[%s1553_s27 + $0x48] ss:$16 sps:$4 sm:$0xff]  }
  0x6b   : > { %1067 = vmatpush3.bf16.msra.mxu1 %v1190_v16  ;;  %1028 = vmatprep.subr.bf16.mxu0 %v1191_v17  ;;  %v1225_v45 = vld [vmem:[%s1553_s27 + $0x64] ss:$16 sps:$4 sm:$0xff]   ;;  %v1227_v46 = vld [vmem:[%s1553_s27 + $0x6c] ss:$16 sps:$4 sm:$0xff]   ;;  %v1229_v47 = vld [vmem:[%s1553_s27 + $0x60] ss:$16 sps:$4 sm:$0xff]  }
  0x6c   : > { %1068 = vmatprep.subr.bf16.mxu1 %v1192_v18  ;;  %v1230_v48 = vld [vmem:[%s1553_s27 + $0x68] ss:$16 sps:$4 sm:$0xff]   ;;  %v284_v12 = vld [vmem:[#allocation2 + $0x10] sm:$0xff] }
  0x6d   : > { %v285_v17 = vld [vmem:[#allocation2 + $0x18] sm:$0xff] }
  0x6e   : > { %1029 = vmatpush3.bf16.msra.mxu0 %v1193_v19 }
  0x6f   : > { %1069 = vmatpush3.bf16.msra.mxu1 %v1194_v20  ;;  %1030 = vmatprep.subr.bf16.mxu0 %v1195_v21 }
  0x70   : > { %1070 = vmatprep.subr.bf16.mxu1 %v1196_v22 }
  0x72   : > { %1031 = vmatpush3.bf16.msra.mxu0 %v1197_v23 }
  0x73   : > { %1071 = vmatpush3.bf16.msra.mxu1 %v1198_v24  ;;  %1032 = vmatprep.subr.bf16.mxu0 %v1199_v25 }
  0x74   : > { %1072 = vmatprep.subr.bf16.mxu1 %v1200_v26 }
  0x76   : > { %1033 = vmatpush3.bf16.msra.mxu0 %v1201_v27 }
  0x77   : > { %1073 = vmatpush3.bf16.msra.mxu1 %v1202_v28  ;;  %1034 = vmatprep.subr.bf16.mxu0 %v1203_v29 }
  0x78   : > { %1074 = vmatprep.subr.bf16.mxu1 %v1204_v30  ;;  %v286_v30 = vld [vmem:[#allocation2 + $0x20] sm:$0xff] }
  0x7a   : > { %1035 = vmatpush3.bf16.msra.mxu0 %v1205_v31 }
  0x7b   : > { %1075 = vmatpush3.bf16.msra.mxu1 %v1206_v32 }
  0x7d   : > { %675 = vmatmul.mubr.bf16.vlgmr.msra.gmra.mrb[0].mxu0 %v1207_v33 }
  0x7e   : > { %740 = vmatmul.mubr.bf16.vlgmr.msra.gmra.mrb[0].mxu1 %v1210_v35  ;;  %682 = vmatprep.mubr.bf16.mxu0 %v1213_v37  ;;  %v287_v35 = vld [vmem:[#allocation2 + $0x28] sm:$0xff] }
  0x7f   : > { %747 = vmatprep.mubr.bf16.mxu1 %v1215_v38 }
  0x85   : > { %683 = vmatmul.mubr.bf16.gmra.mrb[4].mxu0 %v1217_v39 }
  0x86   : > { %748 = vmatmul.mubr.bf16.gmra.mrb[4].mxu1 %v1218_v40  ;;  %690 = vmatprep.mubr.bf16.mxu0 %v1219_v41 }
  0x87   : > { %755 = vmatprep.mubr.bf16.mxu1 %v1221_v42 }
  0x8d   : > { %691 = vmatmul.mubr.bf16.gmra.mrb[8].mxu0 %v1223_v43 }
  0x8e   : > { %756 = vmatmul.mubr.bf16.gmra.mrb[8].mxu1 %v1224_v44  ;;  %698 = vmatprep.mubr.bf16.mxu0 %v1225_v45 }
  0x8f   : > { %763 = vmatprep.mubr.bf16.mxu1 %v1227_v46 }
  0x95   : > { %699 = vmatmul.mubr.bf16.gmra.mrb[12].mxu0 %v1229_v47 }
  0x96   : > { %764 = vmatmul.mubr.bf16.gmra.mrb[12].mxu1 %v1230_v48  ;;  %v288_v48 = vld [vmem:[#allocation2 + $0x30] sm:$0xff] }
 0x150   : > { %v1036_v49 = vpop.f32.mrb[0].mxu0 }
 0x151   : > { %v1076_v50 = vpop.f32.mrb[0].mxu1  ;;  %v1037_v51 = vpop.f32.mrb[1].mxu0 }
 0x152   : > { %v1038_v52 = vadd.f32 %v1037_v51, %v1036_v49  ;;  %v1077_v53 = vpop.f32.mrb[1].mxu1  ;;  %v1039_v54 = vpop.f32.mrb[2].mxu0 }
 0x153   : > { %v1078_v55 = vadd.f32 %v1077_v53, %v1076_v50  ;;  %v1079_v56 = vpop.f32.mrb[2].mxu1  ;;  %v1040_v57 = vpop.f32.mrb[3].mxu0  ;;  %v289_v53 = vld [vmem:[#allocation2 + $0x38] sm:$0xff] }
 0x154   : > { %v1041_v59 = vadd.f32 %v1040_v57, %v1039_v54  ;;  %v1080_v60 = vpop.f32.mrb[3].mxu1 }
 0x155   : > { %v742_v61 = vadd.f32 %v1078_v55, %v1038_v52  ;;  %v1081_v62 = vadd.f32 %v1080_v60, %v1079_v56 }
 0x157   : > { %v772_v0 = vadd.f32 %v742_v61, %v282_v58  ;;  %v745_v1 = vadd.f32 %v1081_v62, %v1041_v59  ;;  %v1013_v58 = vld [vmem:[%s1666_s2] ss:$0 sm:$0xff] (!%p1012_p12) }
 0x158   : > { %v1042_v2 = vpop.f32.mrb[4].mxu0 }
 0x159   : > { %780 = vst [vmem:[#allocation2] sm:$0xff] %v772_v0  ;;  %v773_v3 = vadd.f32 %v745_v1, %v283_v63  ;;  %v1082_v4 = vpop.f32.mrb[4].mxu1  ;;  %v1043_v5 = vpop.f32.mrb[5].mxu0 }
 0x15a   : > { %v1044_v6 = vadd.f32 %v1043_v5, %v1042_v2  ;;  %v1083_v7 = vpop.f32.mrb[5].mxu1  ;;  %v1045_v8 = vpop.f32.mrb[6].mxu0 }
 0x15b   : > { %781 = vst [vmem:[#allocation2 + $0x8] sm:$0xff] %v773_v3  ;;  %v1084_v9 = vadd.f32 %v1083_v7, %v1082_v4  ;;  %v1085_v10 = vpop.f32.mrb[6].mxu1  ;;  %v1046_v11 = vpop.f32.mrb[7].mxu0 }
 0x15c   : > { %v1047_v13 = vadd.f32 %v1046_v11, %v1045_v8  ;;  %v1086_v14 = vpop.f32.mrb[7].mxu1 }
 0x15d   : > { %v750_v15 = vadd.f32 %v1084_v9, %v1044_v6  ;;  %v1087_v16 = vadd.f32 %v1086_v14, %v1085_v10 }
 0x15f   : > { %v774_v18 = vadd.f32 %v750_v15, %v284_v12  ;;  %v753_v19 = vadd.f32 %v1087_v16, %v1047_v13 }
 0x160   : > { %v1048_v20 = vpop.f32.mrb[8].mxu0  ;;  %v792_v57 = vld [vmem:[#allocation2] sm:$0xff] (!%p1012_p12) }
 0x161   : > { %782 = vst [vmem:[#allocation2 + $0x10] sm:$0xff] %v774_v18  ;;  %v775_v21 = vadd.f32 %v753_v19, %v285_v17  ;;  %v1088_v22 = vpop.f32.mrb[8].mxu1  ;;  %v1049_v23 = vpop.f32.mrb[9].mxu0  ;;  %v807_v60 = vadd.f32 (!%p1012_p12), %v1013_v58, %v792_v57 }
 0x162   : > { %v1050_v24 = vadd.f32 %v1049_v23, %v1048_v20  ;;  %v1089_v25 = vpop.f32.mrb[9].mxu1  ;;  %v1051_v26 = vpop.f32.mrb[10].mxu0  ;;  %v793_v59 = vld [vmem:[#allocation2 + $0x8] sm:$0xff] (!%p1012_p12) }
 0x163   : > { %783 = vst [vmem:[#allocation2 + $0x18] sm:$0xff] %v775_v21  ;;  %v1090_v27 = vadd.f32 %v1089_v25, %v1088_v22  ;;  %v1091_v28 = vpop.f32.mrb[10].mxu1  ;;  %v1052_v29 = vpop.f32.mrb[11].mxu0  ;;  %v808_v61 = vadd.f32 (!%p1012_p12), %v1013_v58, %v793_v59  ;;  %v815_v7 = vmax.f32 (!%p1012_p12), %v807_v60, 0.0 }
 0x164   : > { %v1053_v31 = vadd.f32 %v1052_v29, %v1051_v26  ;;  %v1092_v32 = vpop.f32.mrb[11].mxu1 }
 0x165   : > { %v758_v33 = vadd.f32 %v1090_v27, %v1050_v24  ;;  %v1093_v34 = vadd.f32 %v1092_v32, %v1091_v28  ;;  %v816_v8 = vmax.f32 (!%p1012_p12), %v808_v61, 0.0  ;;  %823 = vst [vmem:[#allocation8] sm:$0xff] (!%p1012_p12), %v815_v7 }
 0x167   : > { %v776_v36 = vadd.f32 %v758_v33, %v286_v30  ;;  %v761_v37 = vadd.f32 %v1093_v34, %v1053_v31  ;;  %824 = vst [vmem:[#allocation8 + $0x8] sm:$0xff] (!%p1012_p12), %v816_v8 }
 0x168   : > { %v1054_v38 = vpop.f32.mrb[12].mxu0  ;;  %v794_v62 = vld [vmem:[#allocation2 + $0x10] sm:$0xff] (!%p1012_p12) }
 0x169   : > { %784 = vst [vmem:[#allocation2 + $0x20] sm:$0xff] %v776_v36  ;;  %v777_v39 = vadd.f32 %v761_v37, %v287_v35  ;;  %v1094_v40 = vpop.f32.mrb[12].mxu1  ;;  %v1055_v41 = vpop.f32.mrb[13].mxu0  ;;  %v809_v1 = vadd.f32 (!%p1012_p12), %v1013_v58, %v794_v62 }
 0x16a   : > { %v1056_v42 = vadd.f32 %v1055_v41, %v1054_v38  ;;  %v1095_v43 = vpop.f32.mrb[13].mxu1  ;;  %v1057_v44 = vpop.f32.mrb[14].mxu0  ;;  %v795_v63 = vld [vmem:[#allocation2 + $0x18] sm:$0xff] (!%p1012_p12) }
 0x16b   : > { %785 = vst [vmem:[#allocation2 + $0x28] sm:$0xff] %v777_v39  ;;  %v1096_v45 = vadd.f32 %v1095_v43, %v1094_v40  ;;  %v1097_v46 = vpop.f32.mrb[14].mxu1  ;;  %v1058_v47 = vpop.f32.mrb[15].mxu0  ;;  %v810_v2 = vadd.f32 (!%p1012_p12), %v1013_v58, %v795_v63  ;;  %v817_v11 = vmax.f32 (!%p1012_p12), %v809_v1, 0.0 }
 0x16c   : > { %v1059_v49 = vadd.f32 %v1058_v47, %v1057_v44  ;;  %v1098_v50 = vpop.f32.mrb[15].mxu1 }
 0x16d   : > { %v766_v51 = vadd.f32 %v1096_v45, %v1056_v42  ;;  %v1099_v52 = vadd.f32 %v1098_v50, %v1097_v46  ;;  %791 = sbr.rel (%p1012_p12) target bundleno = 384 (0x180), region = 48  ;;  %v818_v12 = vmax.f32 (!%p1012_p12), %v810_v2, 0.0  ;;  %825 = vst [vmem:[#allocation8 + $0x10] sm:$0xff] (!%p1012_p12), %v817_v11 }
 0x16f   : > { %v778_v54 = vadd.f32 %v766_v51, %v288_v48  ;;  %v769_v55 = vadd.f32 %v1099_v52, %v1059_v49  ;;  %826 = vst [vmem:[#allocation8 + $0x18] sm:$0xff] (!%p1012_p12), %v818_v12 }
 0x170   : > { %v796_v0 = vld [vmem:[#allocation2 + $0x20] sm:$0xff] (!%p1012_p12) }
 0x171   : > { %786 = vst [vmem:[#allocation2 + $0x30] sm:$0xff] %v778_v54  ;;  %v779_v56 = vadd.f32 %v769_v55, %v289_v53  ;;  %v811_v3 = vadd.f32 (!%p1012_p12), %v1013_v58, %v796_v0 }
 0x172   : > { %v797_v4 = vld [vmem:[#allocation2 + $0x28] sm:$0xff] (!%p1012_p12) }
 0x173   : > { %787 = vst [vmem:[#allocation2 + $0x38] sm:$0xff] %v779_v56  ;;  %v812_v9 = vadd.f32 (!%p1012_p12), %v1013_v58, %v797_v4  ;;  %v819_v13 = vmax.f32 (!%p1012_p12), %v811_v3, 0.0 }
 0x175   : > { %v820_v15 = vmax.f32 %v812_v9, 0.0  ;;  %827 = vst [vmem:[#allocation8 + $0x20] sm:$0xff] %v819_v13 }
 0x177   : > { %828 = vst [vmem:[#allocation8 + $0x28] sm:$0xff] %v820_v15 }
 0x178   : > { %v798_v5 = vld [vmem:[#allocation2 + $0x30] sm:$0xff] }
 0x179   : > { %v813_v10 = vadd.f32 %v1013_v58, %v798_v5 }
 0x17a   : > { %v799_v6 = vld [vmem:[#allocation2 + $0x38] sm:$0xff] }
 0x17b   : > { %v814_v14 = vadd.f32 %v1013_v58, %v799_v6  ;;  %v821_v16 = vmax.f32 %v813_v10, 0.0 }
 0x17d   : > { %v822_v17 = vmax.f32 %v814_v14, 0.0  ;;  %829 = vst [vmem:[#allocation8 + $0x30] sm:$0xff] %v821_v16 }
 0x17f   : > { %830 = vst [vmem:[#allocation8 + $0x38] sm:$0xff] %v822_v17 }
 0x180 PF: > { %p1620_p4 = scmp.eq.s32.totalorder %s950_s18, 1  ;;  %s1385_s20 = smov [#allocation8]  }
 0x181   : > { %s841_s22 = sshll.u32 %s1385_s20, 4  ;;  %s842_s22 = int_to_ptr.vmem [resolvable:$true] %s841_s22 }
 0x182   : > { %s1291_s30 = scalar_lea.vmem %s842_s22, 1024  ;;  %p1298_p0 = scmp.lt.s32.totalorder %s842_s22, %s842_s22 }
 0x183   : > { %p1292_p8 = scmp.ne.s32.totalorder %s842_s22, %s1291_s30  ;;  %p1299_p10 = scmp.lt.s32.totalorder %s1291_s30, %s1291_s30 }
 0x185   : > { %p1293_p2 = pnand %p1292_p8, %p1620_p4  ;;  %p1300_p5 = por %p1299_p10, %p1298_p0 }
 0x187   : > { %p1294_p3 = pneg %p1293_p2 }
 0x189   : > { %p1301_p6 = pnand %p1300_p5, %p1294_p3 }
 0x18b   : > { %1304 = shalt.err (!%p1301_p6)
}
 0x18c   : > { %s1305_s18 = scalar_lea.hbm %s1667_s3, 1024 }
 0x18d   : > { %p1306_p11 = scmp.ne.s32.totalorder %s1667_s3, %s1305_s18  ;;  %p1311_p7 = scmp.lt.u32.totalorder %s1305_s18, %s1667_s3 }
 0x18f   : > { %p1307_p13 = pnand %p1306_p11, %p1620_p4 }
 0x191   : > { %p1308_p1 = pneg %p1307_p13 }
 0x193   : > { %p1313_p9 = pnand %p1311_p7, %p1308_p1 }
 0x195   : > { %1316 = shalt.err (!%p1313_p9)
}
 0x196   : > { %s1386_s21 = smov 128   ;;  %s1387_s5 = smov 8  }
 0x197   : > { %1105 = dma.vmem_to_hbm [thread:$0]  (%p1620_p4), %s842_s22, 1024, %s1667_s3, [#allocation5], %s1386_s21, %s1386_s21, %s1387_s5  }
 0x198   : > { %1350 = dma.done.wait (%p1620_p4), [#allocation5], 1024  }
 0x199   : > { %1352 = vsyncadd (%p1620_p4), [#allocation5], 4294966272 }
 0x19a PF: > { %s20_s17 = sadd.s32 1, %s1375_s17   ;;  %s1676_s12 = smov %s1359_s13 }
 0x19b   : > { %p17_p12 = scmp.ge.s32.totalorder %s20_s17, 4   ;;  %s1677_s13 = smov %s1363_s14 }
 0x19c   : > { %s1678_s14 = smov %s1459_s24  ;;  %s1679_s15 = smov %s1371_s16 }
 0x19d   : > { %s1680_s16 = smov %s1682_s19  ;;  %19 = sbr.rel (!%p17_p12) target bundleno = 7 (0x7), region = 94 }
 0x1a4   :  { %857 = vsyncpa [#allocation4], 1 }
 0x1a5   :  { %859 = vsyncpa [#allocation4 + $0x1], 1 }
 0x1a6   :  { %860 = vsyncpa [#allocation7], 1 }
 0x1a7   :  { %862 = vsyncpa [#allocation7 + $0x1], 1 }
 0x1a8   :  { %863 = vsyncpa [#allocation5], 1 }
 0x1a9   :  { %865 = vsyncpa [#allocation5 + $0x1], 1 }

</bundles_post_ra>
